<compile_context>
chip_gen: v6e
topology: v6e:2x2x1
jax: 0.10.0
libtpu: 0.0.40
codegen_flags: <defaults>
</compile_context>

<pallas_src>
import jax
import jax.numpy as jnp
from jax import lax
from jax.experimental import pallas as pl
from jax.experimental.pallas import tpu as pltpu

INPUT_DIM = 768
HIDDEN_DIM = 256
OUTPUT_DIM = 128
LN_EPS = 1e-5  # nn.LayerNorm default


# --------------------------------------------------------------------------
# Kernel
# --------------------------------------------------------------------------
def _make_kernel(mxu_dtype):
    def encoder_kernel(x_ref, w1_ref, b1_ref, w2_ref, ln_ref, o_ref):
        # x arrives in its HBM dtype (usually f32); cast to the MXU dtype in
        # VMEM so no extra HBM pass is spent on a boundary cast.
        x = x_ref[...].astype(mxu_dtype)

        # First linear (MXU, f32 accumulate) + bias + ReLU.
        h = jnp.dot(x, w1_ref[...], preferred_element_type=jnp.float32)
        h = jnp.maximum(h + b1_ref[...].astype(jnp.float32), 0.0)

        # Second linear, MXU operands in mxu_dtype, f32 accumulate.
        y = jnp.dot(h.astype(mxu_dtype), w2_ref[...],
                    preferred_element_type=jnp.float32)

        ln = ln_ref[...].astype(jnp.float32)   # rows: [b2; gamma; beta]
        y = y + ln[0:1, :]

        # LayerNorm over the feature axis — two-pass (centered) stats in f32.
        mean = jnp.mean(y, axis=-1, keepdims=True)
        yc = y - mean
        var = jnp.mean(yc * yc, axis=-1, keepdims=True)
        out = yc * lax.rsqrt(var + LN_EPS) * ln[1:2, :] + ln[2:3, :]

        o_ref[...] = out.astype(o_ref.dtype)

    return encoder_kernel


# --------------------------------------------------------------------------
# Host-side helpers
# --------------------------------------------------------------------------
def _round_up(n, m):
    return ((n + m - 1) // m) * m


def _chip_props():
    """Best-effort (tensorcores-per-device, physical VMEM bytes per core)."""
    kind = ""
    try:
        kind = jax.devices()[0].device_kind.lower()
    except Exception:  # hardware probe only; safe defaults below
        pass
    is_v7 = "v7" in kind
    if is_v7 or "v4" in kind or ("v5p" in kind):
        num_tc = 2          # 2 TensorCores per device (v7x / megacore)
    else:
        num_tc = 1          # v5e / v6e: single TensorCore
    vmem = (64 << 20) if is_v7 else (128 << 20)
    try:
        info = pltpu.get_tpu_info()
        vmem = int(getattr(info, "vmem_capacity_bytes", vmem)) or vmem
    except Exception:  # probe failure -> keep heuristic value
        pass
    return num_tc, vmem


def _choose_tile(batch, tb_max, num_tc):
    """Batch tile: as large as allowed; multiple of 16 (packed-bf16 sublane
    tile); only force >=2 grid steps on chips that actually have 2 TCs."""
    b16 = _round_up(max(batch, 1), 16)
    tb = min(_round_up(tb_max, 16), b16)
    if num_tc >= 2 and pl.cdiv(batch, tb) < num_tc and b16 >= 16 * num_tc:
        tb = _round_up(pl.cdiv(b16, num_tc), 16)
    grid_m = pl.cdiv(batch, tb)
    return tb, grid_m


def _vmem_limit(tb, x_isz, mxu_isz, out_isz, x_buffers, vmem_bytes):
    """Dtype-accurate working-set estimate (no double counting) + margin,
    capped at 7/8 of physical VMEM (headroom for compiler scratch)."""
    x_in = x_buffers * tb * INPUT_DIM * x_isz             # pipelined x buffers
    out = 2 * tb * OUTPUT_DIM * out_isz                   # double-buffered out
    weights = (INPUT_DIM * HIDDEN_DIM + HIDDEN_DIM * OUTPUT_DIM) * mxu_isz
    consts = 4 * (HIDDEN_DIM + 3 * OUTPUT_DIM)            # b1 + packed LN row
    interm = (tb * INPUT_DIM * mxu_isz                    # in-VMEM cast of x
              + tb * HIDDEN_DIM * (4 + mxu_isz)           # h (f32) + cast
              + tb * OUTPUT_DIM * 4)                      # y (f32)
    est = x_in + out + weights + consts + interm
    cap = (vmem_bytes * 7) // 8
    return int(min(cap, max(est + (4 << 20), 16 << 20)))


def _cost_estimate(batch, x_isz, mxu_isz, out_isz):
    flops = 2 * batch * (INPUT_DIM * HIDDEN_DIM + HIDDEN_DIM * OUTPUT_DIM)
    bytes_accessed = (batch * INPUT_DIM * x_isz
                      + (INPUT_DIM * HIDDEN_DIM + HIDDEN_DIM * OUTPUT_DIM) * mxu_isz
                      + 4 * (HIDDEN_DIM + 3 * OUTPUT_DIM)
                      + batch * OUTPUT_DIM * out_isz)
    return pl.CostEstimate(flops=flops, transcendentals=0,
                           bytes_accessed=bytes_accessed)


def _build_call(tb, grid_m, batch, out_dtype, mxu_dtype,
                vmem_limit, cost, x_buffers, use_buffered_specs):
    def const_spec(shape):
        if use_buffered_specs:
            # Constant across grid steps: single-buffer to save VMEM headroom.
            return pl.BlockSpec(shape, lambda i: (0, 0),
                                pipeline_mode=pl.Buffered(1))
        return pl.BlockSpec(shape, lambda i: (0, 0))

    if use_buffered_specs and x_buffers != 2:
        x_spec = pl.BlockSpec((tb, INPUT_DIM), lambda i: (i, 0),
                              pipeline_mode=pl.Buffered(x_buffers))
    else:
        x_spec = pl.BlockSpec((tb, INPUT_DIM), lambda i: (i, 0))

    return pl.pallas_call(
        _make_kernel(mxu_dtype),
        out_shape=jax.ShapeDtypeStruct((batch, OUTPUT_DIM), out_dtype),
        grid_spec=pltpu.PrefetchScalarGridSpec(
            num_scalar_prefetch=0,
            grid=(grid_m,),
            in_specs=[
                x_spec,                                   # x tile
                const_spec((INPUT_DIM, HIDDEN_DIM)),      # W1^T
                const_spec((1, HIDDEN_DIM)),              # b1
                const_spec((HIDDEN_DIM, OUTPUT_DIM)),     # W2^T
                const_spec((3, OUTPUT_DIM)),              # [b2; gamma; beta]
            ],
            out_specs=pl.BlockSpec((tb, OUTPUT_DIM), lambda i: (i, 0)),
        ),
        compiler_params=pltpu.CompilerParams(
            dimension_semantics=("parallel",),
            vmem_limit_bytes=vmem_limit,
        ),
        cost_estimate=cost,
    )


# --------------------------------------------------------------------------
# Public wrapper
# --------------------------------------------------------------------------
def simple_encoder(x, w1, b1, w2, b2, gamma, beta, *, tb=None, use_bf16=True,
                   out_dtype=None):
    """x: [B, INPUT_DIM] -> [B, OUTPUT_DIM]. Weights pre-transposed
    [in, out]; biases / LayerNorm affine are [1, features] (or flat)."""
    B, D = x.shape
    assert D == INPUT_DIM

    num_tc, vmem_bytes = _chip_props()
    if tb is None:
        # Big tiles amortize the ~0.35us/step overhead; smaller on v7x (64MiB VMEM).
        tb = 2048 if vmem_bytes <= (64 << 20) else 4096
    tb_eff, grid_m = _choose_tile(B, tb, num_tc)

    mxu_dtype = jnp.bfloat16 if use_bf16 else x.dtype
    out_dtype = x.dtype if out_dtype is None else jnp.dtype(out_dtype)

    # Only the tiny constant weights are cast at the boundary; the x stream
    # keeps its HBM dtype and is cast to the MXU dtype in VMEM in-kernel.
    w1c = w1.astype(mxu_dtype)
    w2c = w2.astype(mxu_dtype)
    b1c = b1.reshape(1, HIDDEN_DIM)
    ln_pack = jnp.concatenate(
        [b2.reshape(1, OUTPUT_DIM),
         gamma.reshape(1, OUTPUT_DIM),
         beta.reshape(1, OUTPUT_DIM)], axis=0)            # (3, 128)

    x_isz = jnp.dtype(x.dtype).itemsize
    mxu_isz = jnp.dtype(mxu_dtype).itemsize
    out_isz = jnp.dtype(out_dtype).itemsize

    # Third x buffer only pays off on 2-TC chips with long grids.
    x_buffers = 3 if (num_tc >= 2 and grid_m >= 4) else 2
    vmem_limit = _vmem_limit(tb_eff, x_isz, mxu_isz, out_isz, x_buffers,
                             vmem_bytes)
    cost = _cost_estimate(B, x_isz, mxu_isz, out_isz)

    args = (x, w1c, b1c, w2c, ln_pack)
    try:
        call = _build_call(tb_eff, grid_m, B, out_dtype, mxu_dtype,
                           vmem_limit, cost, x_buffers, True)
        return call(*args)
    except (TypeError, AttributeError, NotImplementedError,
            pltpu.LoweringException):
        # Narrow fallback: only for jax versions / lowering paths that reject
        # pipeline_mode / pl.Buffered; genuine errors re-raise from here.
        call = _build_call(tb_eff, grid_m, B, out_dtype, mxu_dtype,
                           vmem_limit, cost, 2, False)
        return call(*args)


# --------------------------------------------------------------------------
# Reference + self-test
# --------------------------------------------------------------------------
def reference(x, w1, b1, w2, b2, gamma, beta):
    h = jnp.maximum(x @ w1 + b1, 0.0)
    y = h @ w2 + b2
    mean = jnp.mean(y, axis=-1, keepdims=True)
    var = jnp.mean((y - mean) ** 2, axis=-1, keepdims=True)
    return (y - mean) / jnp.sqrt(var + LN_EPS) * gamma + beta


if __name__ == "__main__":
    key = jax.random.PRNGKey(0)
    k_x, k_w1, k_b1, k_w2, k_b2 = jax.random.split(key, 5)

    B = 32  # small batch (exercises a 2-step parallel grid on 2-TC chips)
    x = jax.random.normal(k_x, (B, INPUT_DIM), dtype=jnp.float32)

    # Deterministic parameters, stored pre-transposed [in_features, out_features].
    w1 = jax.random.normal(k_w1, (INPUT_DIM, HIDDEN_DIM), dtype=jnp.float32) * 0.02
    b1 = jax.random.normal(k_b1, (1, HIDDEN_DIM), dtype=jnp.float32) * 0.01
    w2 = jax.random.normal(k_w2, (HIDDEN_DIM, OUTPUT_DIM), dtype=jnp.float32) * 0.02
    b2 = jax.random.normal(k_b2, (1, OUTPUT_DIM), dtype=jnp.float32) * 0.01
    gamma = jnp.ones((1, OUTPUT_DIM), dtype=jnp.float32)
    beta = jnp.zeros((1, OUTPUT_DIM), dtype=jnp.float32)

    ref = reference(x, w1, b1, w2, b2, gamma, beta)

    # f32 path: close match against the reference.
    out_f32 = jax.block_until_ready(
        simple_encoder(x, w1, b1, w2, b2, gamma, beta, use_bf16=False))
    assert out_f32.shape == (B, OUTPUT_DIM)
    assert jnp.allclose(out_f32, ref, atol=1e-4, rtol=1e-4), "f32 mismatch"

    # Default bf16-MXU path (f32 accumulation + f32 LayerNorm): small error.
    out_bf16 = jax.block_until_ready(
        simple_encoder(x, w1, b1, w2, b2, gamma, beta))
    assert out_bf16.shape == (B, OUTPUT_DIM)
    assert jnp.allclose(out_bf16, ref, atol=7.5e-2, rtol=5e-2), "bf16 mismatch"

    # bf16 output stream (halves output write traffic when consumer accepts it).
    out_bf16o = jax.block_until_ready(
        simple_encoder(x, w1, b1, w2, b2, gamma, beta, out_dtype=jnp.bfloat16))
    assert out_bf16o.shape == (B, OUTPUT_DIM) and out_bf16o.dtype == jnp.bfloat16
    assert jnp.allclose(out_bf16o.astype(jnp.float32), ref,
                        atol=1.5e-1, rtol=1e-1), "bf16-out mismatch"

    # Ragged batch: cdiv grid + masked partial tail block (no pad / no slice).
    out_ragged = jax.block_until_ready(
        simple_encoder(x[:13], w1, b1, w2, b2, gamma, beta, use_bf16=False))
    assert out_ragged.shape == (13, OUTPUT_DIM)
    assert jnp.allclose(out_ragged, ref[:13], atol=1e-4, rtol=1e-4), "ragged mismatch"

    print("KERNEL_OK")
</pallas_src>

<mosaic_0001>
module attributes {stable_mosaic.version = 11 : i64} {
  func.func @encoder_kernel(%arg0: i32, %arg1: memref<32x768xf32, #tpu.memory_space<vmem>>, %arg2: memref<768x256xf32, #tpu.memory_space<vmem>>, %arg3: memref<1x256xf32, #tpu.memory_space<vmem>>, %arg4: memref<256x128xf32, #tpu.memory_space<vmem>>, %arg5: memref<3x128xf32, #tpu.memory_space<vmem>>, %arg6: memref<32x128xf32, #tpu.memory_space<vmem>>) attributes {dimension_semantics = [#tpu.dimension_semantics<parallel>], iteration_bounds = array<i64: 1>, scalar_prefetch = 0 : i64, scratch_operands = 0 : i64, tpu.core_type = #tpu.core_type<tc>, window_params = [{transform_indices = @transform_0, window_bounds = array<i64: 32, 768>}, {pipeline_mode = #tpu.pipeline_mode<synchronous>, transform_indices = @transform_1, window_bounds = array<i64: 768, 256>}, {pipeline_mode = #tpu.pipeline_mode<synchronous>, transform_indices = @transform_2, window_bounds = array<i64: 1, 256>}, {pipeline_mode = #tpu.pipeline_mode<synchronous>, transform_indices = @transform_3, window_bounds = array<i64: 256, 128>}, {pipeline_mode = #tpu.pipeline_mode<synchronous>, transform_indices = @transform_4, window_bounds = array<i64: 3, 128>}, {transform_indices = @transform_5, window_bounds = array<i64: 32, 128>}]} {
    %c0 = arith.constant 0 : index
    %c0_0 = arith.constant 0 : index
    %0 = vector.load %arg1[%c0, %c0_0] : memref<32x768xf32, #tpu.memory_space<vmem>>, vector<32x768xf32>
    %c0_1 = arith.constant 0 : index
    %c0_2 = arith.constant 0 : index
    %1 = vector.load %arg2[%c0_1, %c0_2] : memref<768x256xf32, #tpu.memory_space<vmem>>, vector<768x256xf32>
    %cst = arith.constant dense<0.000000e+00> : vector<32x256xf32>
    %2 = tpu.matmul %0, %1, %cst {dimension_numbers = #tpu.dot_dimension_numbers<[1], [0], [0], [1], [0, 0, 1, 1], [], []>} : vector<32x768xf32>, vector<768x256xf32>, vector<32x256xf32> -> vector<32x256xf32>
    %c0_3 = arith.constant 0 : index
    %c0_4 = arith.constant 0 : index
    %3 = vector.load %arg3[%c0_3, %c0_4] : memref<1x256xf32, #tpu.memory_space<vmem>>, vector<1x256xf32>
    %4 = vector.broadcast %3 : vector<1x256xf32> to vector<32x256xf32>
    %5 = arith.addf %2, %4 : vector<32x256xf32>
    %cst_5 = arith.constant 0.000000e+00 : f32
    %6 = vector.broadcast %cst_5 : f32 to vector<32x256xf32>
    %7 = arith.maximumf %5, %6 : vector<32x256xf32>
    %c0_6 = arith.constant 0 : index
    %c0_7 = arith.constant 0 : index
    %8 = vector.load %arg4[%c0_6, %c0_7] : memref<256x128xf32, #tpu.memory_space<vmem>>, vector<256x128xf32>
    %cst_8 = arith.constant dense<0.000000e+00> : vector<32x128xf32>
    %9 = tpu.matmul %7, %8, %cst_8 {dimension_numbers = #tpu.dot_dimension_numbers<[1], [0], [0], [1], [0, 0, 1, 1], [], []>} : vector<32x256xf32>, vector<256x128xf32>, vector<32x128xf32> -> vector<32x128xf32>
    %c0_9 = arith.constant 0 : index
    %c0_10 = arith.constant 0 : index
    %10 = vector.load %arg5[%c0_9, %c0_10] : memref<3x128xf32, #tpu.memory_space<vmem>>, vector<3x128xf32>
    %11 = vector.extract_strided_slice %10 {offsets = [0, 0], sizes = [1, 128], strides = [1, 1]} : vector<3x128xf32> to vector<1x128xf32>
    %12 = vector.broadcast %11 : vector<1x128xf32> to vector<32x128xf32>
    %13 = arith.addf %9, %12 : vector<32x128xf32>
    %cst_11 = arith.constant dense<0.000000e+00> : vector<32xf32>
    %14 = vector.multi_reduction <add>, %13, %cst_11 [1] : vector<32x128xf32> to vector<32xf32>
    %15 = vector.shape_cast %14 : vector<32xf32> to vector<32x1xf32>
    %cst_12 = arith.constant 1.280000e+02 : f32
    %16 = vector.broadcast %cst_12 : f32 to vector<32x1xf32>
    %17 = arith.divf %15, %16 : vector<32x1xf32>
    %18 = vector.broadcast %17 : vector<32x1xf32> to vector<32x128xf32>
    %19 = arith.subf %13, %18 : vector<32x128xf32>
    %20 = arith.mulf %19, %19 : vector<32x128xf32>
    %cst_13 = arith.constant dense<0.000000e+00> : vector<32xf32>
    %21 = vector.multi_reduction <add>, %20, %cst_13 [1] : vector<32x128xf32> to vector<32xf32>
    %22 = vector.shape_cast %21 : vector<32xf32> to vector<32x1xf32>
    %cst_14 = arith.constant 1.280000e+02 : f32
    %23 = vector.broadcast %cst_14 : f32 to vector<32x1xf32>
    %24 = arith.divf %22, %23 : vector<32x1xf32>
    %cst_15 = arith.constant 9.99999974E-6 : f32
    %25 = vector.broadcast %cst_15 : f32 to vector<32x1xf32>
    %26 = arith.addf %24, %25 : vector<32x1xf32>
    %27 = math.rsqrt %26 : vector<32x1xf32>
    %28 = vector.broadcast %27 : vector<32x1xf32> to vector<32x128xf32>
    %29 = arith.mulf %19, %28 : vector<32x128xf32>
    %30 = vector.extract_strided_slice %10 {offsets = [1, 0], sizes = [1, 128], strides = [1, 1]} : vector<3x128xf32> to vector<1x128xf32>
    %31 = vector.broadcast %30 : vector<1x128xf32> to vector<32x128xf32>
    %32 = arith.mulf %29, %31 : vector<32x128xf32>
    %33 = vector.extract_strided_slice %10 {offsets = [2, 0], sizes = [1, 128], strides = [1, 1]} : vector<3x128xf32> to vector<1x128xf32>
    %34 = vector.broadcast %33 : vector<1x128xf32> to vector<32x128xf32>
    %35 = arith.addf %32, %34 : vector<32x128xf32>
    %c0_16 = arith.constant 0 : index
    %c0_17 = arith.constant 0 : index
    %36 = vector.load %arg6[%c0_16, %c0_17] : memref<32x128xf32, #tpu.memory_space<vmem>>, vector<32x128xf32>
    tpu.vector_store %arg6[%c0_16, %c0_17], %35 {strides = array<i32>} : memref<32x128xf32, #tpu.memory_space<vmem>>, vector<32x128xf32>,
    return
  }
  func.func @transform_0(%arg0: i32) -> (i32, i32) {
    %c0_i32 = arith.constant 0 : i32
    %c0_i32_0 = arith.constant 0 : i32
    return %arg0, %c0_i32 : i32, i32
  }
  func.func @transform_1(%arg0: i32) -> (i32, i32) {
    %c0_i32 = arith.constant 0 : i32
    %c0_i32_0 = arith.constant 0 : i32
    %c0_i32_1 = arith.constant 0 : i32
    return %c0_i32, %c0_i32_0 : i32, i32
  }
  func.func @transform_2(%arg0: i32) -> (i32, i32) {
    %c0_i32 = arith.constant 0 : i32
    %c0_i32_0 = arith.constant 0 : i32
    %c0_i32_1 = arith.constant 0 : i32
    return %c0_i32, %c0_i32_0 : i32, i32
  }
  func.func @transform_3(%arg0: i32) -> (i32, i32) {
    %c0_i32 = arith.constant 0 : i32
    %c0_i32_0 = arith.constant 0 : i32
    %c0_i32_1 = arith.constant 0 : i32
    return %c0_i32, %c0_i32_0 : i32, i32
  }
  func.func @transform_4(%arg0: i32) -> (i32, i32) {
    %c0_i32 = arith.constant 0 : i32
    %c0_i32_0 = arith.constant 0 : i32
    %c0_i32_1 = arith.constant 0 : i32
    return %c0_i32, %c0_i32_0 : i32, i32
  }
  func.func @transform_5(%arg0: i32) -> (i32, i32) {
    %c0_i32 = arith.constant 0 : i32
    %c0_i32_0 = arith.constant 0 : i32
    return %arg0, %c0_i32 : i32, i32
  }
}

</mosaic_0001>

<bundles_post_ra>
// kernel: tpu_custom_call.1
= control target key start
LH: loop header
LB: loop body
LE: loop exit
PB: predicated region body
PF: predicated region fallthrough
CT: control target
= control target key end

     0   :  { %10 = vsyncpa [#allocation3], 0  ;;  %s995_s0 = inlined_call_operand.hbm [shape: f32[32,768], index: 0, kind: input, shape index: {}]   ;;  %s996_s1 = inlined_call_operand.hbm [shape: f32[768,256], index: 1, kind: input, shape index: {}]   ;;  %s997_s2 = inlined_call_operand.vmem [shape: f32[1,256], index: 2, kind: input, shape index: {}]   ;;  %s998_s3 = inlined_call_operand.hbm [shape: f32[256,128], index: 3, kind: input, shape index: {}]   ;;  %s999_s4 = inlined_call_operand.vmem [shape: f32[3,128], index: 4, kind: input, shape index: {}]   ;;  %s1000_s5 = inlined_call_operand.hbm [shape: f32[32,128], index: 5, kind: output, shape index: {}]  }
   0x1   :  { %11 = vsyncpa [#allocation6], 0 }
   0x2   :  { %12 = vsyncpa [#allocation4], 0  ;;  %s918_s18 = smov [#allocation5]  }
   0x3   :  { %s30_s19 = sshll.u32 %s918_s18, 4  ;;  %s31_s19 = int_to_ptr.vmem [resolvable:$true] %s30_s19 }
   0x4   :  { %s840_s20 = scalar_lea.vmem %s31_s19, 24576  ;;  %p845_p1 = scmp.lt.s32.totalorder %s31_s19, %s31_s19 }
   0x5   :  { %p841_p0 = scmp.ne.s32.totalorder %s31_s19, %s840_s20  ;;  %p846_p2 = scmp.lt.s32.totalorder %s840_s20, %s840_s20 }
   0x7   :  { %p847_p3 = por %p846_p2, %p845_p1 }
   0x9   :  { %p848_p4 = pnand %p847_p3, %p841_p0 }
   0xb   :  { %851 = shalt.err (!%p848_p4)
}
   0xc   :  { %s919_s21 = smov 256   ;;  %s920_s22 = smov 16  }
   0xd   :  { %36 = dma.hbm_to_vmem [thread:$0]  %s996_s1, 24576, %s31_s19, [#allocation6], %s919_s21, %s919_s21, %s920_s22  }
   0xe   :  { %s921_s25 = smov [#allocation2]  }
   0xf   :  { %s18_s26 = sshll.u32 %s921_s25, 4  ;;  %s19_s26 = int_to_ptr.vmem [resolvable:$true] %s18_s26 }
  0x10   :  { %s860_s27 = scalar_lea.vmem %s19_s26, 3072  ;;  %p865_p6 = scmp.lt.s32.totalorder %s19_s26, %s19_s26 }
  0x11   :  { %p861_p5 = scmp.ne.s32.totalorder %s19_s26, %s860_s27  ;;  %p866_p7 = scmp.lt.s32.totalorder %s860_s27, %s860_s27 }
  0x13   :  { %p867_p8 = por %p866_p7, %p865_p6 }
  0x15   :  { %p868_p9 = pnand %p867_p8, %p861_p5 }
  0x17   :  { %871 = shalt.err (!%p868_p9)
}
  0x18   :  { %s922_s28 = smov 768   ;;  %s923_s29 = smov 48  }
  0x19   :  { %24 = dma.hbm_to_vmem [thread:$0]  %s995_s0, 3072, %s19_s26, [#allocation3], %s922_s28, %s922_s28, %s923_s29  }
  0x1a   :  { %s924_s7 = smov [#allocation7]  }
  0x1b   :  { %s44_s8 = sshll.u32 %s924_s7, 4  ;;  %s45_s8 = int_to_ptr.vmem [resolvable:$true] %s44_s8 }
  0x1c   :  { %s880_s1 = scalar_lea.vmem %s45_s8, 4096  ;;  %p885_p11 = scmp.lt.s32.totalorder %s45_s8, %s45_s8 }
  0x1d   :  { %p881_p10 = scmp.ne.s32.totalorder %s45_s8, %s880_s1  ;;  %p886_p12 = scmp.lt.s32.totalorder %s880_s1, %s880_s1 }
  0x1f   :  { %p887_p13 = por %p886_p12, %p885_p11 }
  0x21   :  { %p888_p0 = pnand %p887_p13, %p881_p10 }
  0x23   :  { %891 = shalt.err (!%p888_p0)
}
  0x24   :  { %s925_s9 = smov 128   ;;  %s926_s10 = smov 8  }
  0x25   :  { %50 = dma.hbm_to_vmem [thread:$0]  %s998_s3, 4096, %s45_s8, [#allocation6], %s925_s9, %s925_s9, %s926_s10  }
  0x26   :  { %912 = dma.done.wait [#allocation3], 3072  }
  0x27   :  { %913 = vsyncadd [#allocation3], 4294964224 }
  0x28   :  { %914 = dma.done.wait [#allocation6], 28672  }
  0x29   :  { %915 = vsyncadd [#allocation6], 4294938624  ;;  %v117_v0 = vld [vmem:[#allocation5 + $0xf8] sm:$0xff]  ;;  %v116_v1 = vld [vmem:[#allocation5 + $0xf0] sm:$0xff] }
  0x2a   :  { %v115_v2 = vld [vmem:[#allocation5 + $0xe8] sm:$0xff]  ;;  %290 = vmatprep.subr.mxu0 %v117_v0  ;;  %v181_v3 = vld [vmem:[#allocation5 + $0x2f8] sm:$0xff]  ;;  %v114_v4 = vld [vmem:[#allocation5 + $0xe0] sm:$0xff] }
  0x2b   :  { %v180_v5 = vld [vmem:[#allocation5 + $0x2f0] sm:$0xff]  ;;  %291 = vmatpush1.msra.mxu0 %v116_v1  ;;  %379 = vmatprep.subr.mxu1 %v181_v3  ;;  %v113_v6 = vld [vmem:[#allocation5 + $0xd8] sm:$0xff]  ;;  %v179_v7 = vld [vmem:[#allocation5 + $0x2e8] sm:$0xff] }
  0x2c   :  { %292 = vmatprep.subr.mxu0 %v115_v2  ;;  %380 = vmatpush1.msra.mxu1 %v180_v5  ;;  %v112_v8 = vld [vmem:[#allocation5 + $0xd0] sm:$0xff]  ;;  %v178_v9 = vld [vmem:[#allocation5 + $0x2e0] sm:$0xff]  ;;  %v177_v10 = vld [vmem:[#allocation5 + $0x2d8] sm:$0xff] }
  0x2d   :  { %293 = vmatpush1.msra.mxu0 %v114_v4  ;;  %381 = vmatprep.subr.mxu1 %v179_v7  ;;  %v111_v11 = vld [vmem:[#allocation5 + $0xc8] sm:$0xff]  ;;  %v176_v12 = vld [vmem:[#allocation5 + $0x2d0] sm:$0xff]  ;;  %v110_v13 = vld [vmem:[#allocation5 + $0xc0] sm:$0xff] }
  0x2e   :  { %294 = vmatprep.subr.mxu0 %v113_v6  ;;  %382 = vmatpush1.msra.mxu1 %v178_v9  ;;  %v175_v14 = vld [vmem:[#allocation5 + $0x2c8] sm:$0xff]  ;;  %v109_v15 = vld [vmem:[#allocation5 + $0xb8] sm:$0xff]  ;;  %v174_v16 = vld [vmem:[#allocation5 + $0x2c0] sm:$0xff] }
  0x2f   :  { %295 = vmatpush1.msra.mxu0 %v112_v8  ;;  %383 = vmatprep.subr.mxu1 %v177_v10  ;;  %v108_v17 = vld [vmem:[#allocation5 + $0xb0] sm:$0xff]  ;;  %v173_v18 = vld [vmem:[#allocation5 + $0x2b8] sm:$0xff]  ;;  %v107_v19 = vld [vmem:[#allocation5 + $0xa8] sm:$0xff] }
  0x30   :  { %296 = vmatprep.subr.mxu0 %v111_v11  ;;  %384 = vmatpush1.msra.mxu1 %v176_v12  ;;  %v172_v20 = vld [vmem:[#allocation5 + $0x2b0] sm:$0xff]  ;;  %v106_v21 = vld [vmem:[#allocation5 + $0xa0] sm:$0xff]  ;;  %v171_v22 = vld [vmem:[#allocation5 + $0x2a8] sm:$0xff] }
  0x31   :  { %297 = vmatpush1.msra.mxu0 %v110_v13  ;;  %385 = vmatprep.subr.mxu1 %v175_v14  ;;  %v105_v23 = vld [vmem:[#allocation5 + $0x98] sm:$0xff]  ;;  %v170_v24 = vld [vmem:[#allocation5 + $0x2a0] sm:$0xff]  ;;  %v104_v25 = vld [vmem:[#allocation5 + $0x90] sm:$0xff] }
  0x32   :  { %298 = vmatprep.subr.mxu0 %v109_v15  ;;  %386 = vmatpush1.msra.mxu1 %v174_v16  ;;  %v169_v26 = vld [vmem:[#allocation5 + $0x298] sm:$0xff]  ;;  %v103_v27 = vld [vmem:[#allocation5 + $0x88] sm:$0xff]  ;;  %v168_v28 = vld [vmem:[#allocation5 + $0x290] sm:$0xff] }
  0x33   :  { %299 = vmatpush1.msra.mxu0 %v108_v17  ;;  %387 = vmatprep.subr.mxu1 %v173_v18  ;;  %v102_v29 = vld [vmem:[#allocation5 + $0x80] sm:$0xff]  ;;  %v167_v30 = vld [vmem:[#allocation5 + $0x288] sm:$0xff]  ;;  %v101_v31 = vld [vmem:[#allocation5 + $0x78] sm:$0xff] }
  0x34   :  { %300 = vmatprep.subr.mxu0 %v107_v19  ;;  %388 = vmatpush1.msra.mxu1 %v172_v20  ;;  %v166_v32 = vld [vmem:[#allocation5 + $0x280] sm:$0xff]  ;;  %v100_v33 = vld [vmem:[#allocation5 + $0x70] sm:$0xff]  ;;  %v165_v34 = vld [vmem:[#allocation5 + $0x278] sm:$0xff] }
  0x35   :  { %301 = vmatpush1.msra.mxu0 %v106_v21  ;;  %389 = vmatprep.subr.mxu1 %v171_v22  ;;  %v99_v35 = vld [vmem:[#allocation5 + $0x68] sm:$0xff]  ;;  %v164_v36 = vld [vmem:[#allocation5 + $0x270] sm:$0xff]  ;;  %v98_v37 = vld [vmem:[#allocation5 + $0x60] sm:$0xff] }
  0x36   :  { %302 = vmatprep.subr.mxu0 %v105_v23  ;;  %390 = vmatpush1.msra.mxu1 %v170_v24  ;;  %v163_v38 = vld [vmem:[#allocation5 + $0x268] sm:$0xff]  ;;  %v97_v39 = vld [vmem:[#allocation5 + $0x58] sm:$0xff]  ;;  %v162_v40 = vld [vmem:[#allocation5 + $0x260] sm:$0xff] }
  0x37   :  { %303 = vmatpush1.msra.mxu0 %v104_v25  ;;  %391 = vmatprep.subr.mxu1 %v169_v26  ;;  %v96_v41 = vld [vmem:[#allocation5 + $0x50] sm:$0xff]  ;;  %v161_v42 = vld [vmem:[#allocation5 + $0x258] sm:$0xff]  ;;  %v95_v43 = vld [vmem:[#allocation5 + $0x48] sm:$0xff] }
  0x38   :  { %304 = vmatprep.subr.mxu0 %v103_v27  ;;  %392 = vmatpush1.msra.mxu1 %v168_v28  ;;  %v160_v44 = vld [vmem:[#allocation5 + $0x250] sm:$0xff]  ;;  %v94_v45 = vld [vmem:[#allocation5 + $0x40] sm:$0xff]  ;;  %v159_v46 = vld [vmem:[#allocation5 + $0x248] sm:$0xff] }
  0x39   :  { %305 = vmatpush1.msra.mxu0 %v102_v29  ;;  %393 = vmatprep.subr.mxu1 %v167_v30  ;;  %v93_v47 = vld [vmem:[#allocation5 + $0x38] sm:$0xff]  ;;  %v158_v48 = vld [vmem:[#allocation5 + $0x240] sm:$0xff]  ;;  %v92_v49 = vld [vmem:[#allocation5 + $0x30] sm:$0xff] }
  0x3a   :  { %306 = vmatprep.subr.mxu0 %v101_v31  ;;  %394 = vmatpush1.msra.mxu1 %v166_v32  ;;  %v157_v50 = vld [vmem:[#allocation5 + $0x238] sm:$0xff]  ;;  %v91_v51 = vld [vmem:[#allocation5 + $0x28] sm:$0xff]  ;;  %v156_v52 = vld [vmem:[#allocation5 + $0x230] sm:$0xff] }
  0x3b   :  { %307 = vmatpush1.msra.mxu0 %v100_v33  ;;  %395 = vmatprep.subr.mxu1 %v165_v34  ;;  %v90_v53 = vld [vmem:[#allocation5 + $0x20] sm:$0xff]  ;;  %v155_v54 = vld [vmem:[#allocation5 + $0x228] sm:$0xff]  ;;  %v89_v55 = vld [vmem:[#allocation5 + $0x18] sm:$0xff] }
  0x3c   :  { %308 = vmatprep.subr.mxu0 %v99_v35  ;;  %396 = vmatpush1.msra.mxu1 %v164_v36  ;;  %v154_v56 = vld [vmem:[#allocation5 + $0x220] sm:$0xff]  ;;  %v88_v57 = vld [vmem:[#allocation5 + $0x10] sm:$0xff]  ;;  %v153_v58 = vld [vmem:[#allocation5 + $0x218] sm:$0xff] }
  0x3d   :  { %309 = vmatpush1.msra.mxu0 %v98_v37  ;;  %397 = vmatprep.subr.mxu1 %v163_v38  ;;  %v87_v59 = vld [vmem:[#allocation5 + $0x8] sm:$0xff]  ;;  %v152_v60 = vld [vmem:[#allocation5 + $0x210] sm:$0xff]  ;;  %v86_v61 = vld [vmem:[#allocation5] sm:$0xff] }
  0x3e   :  { %310 = vmatprep.subr.mxu0 %v97_v39  ;;  %398 = vmatpush1.msra.mxu1 %v162_v40  ;;  %v151_v62 = vld [vmem:[#allocation5 + $0x208] sm:$0xff]  ;;  %v149_v63 = vld [vmem:[#allocation5 + $0x1f8] sm:$0xff]  ;;  %v150_v0 = vld [vmem:[#allocation5 + $0x200] sm:$0xff] }
  0x3f   :  { %311 = vmatpush1.msra.mxu0 %v96_v41  ;;  %399 = vmatprep.subr.mxu1 %v161_v42  ;;  %v148_v1 = vld [vmem:[#allocation5 + $0x1f0] sm:$0xff]  ;;  %v213_v2 = vld [vmem:[#allocation5 + $0x3f8] sm:$0xff]  ;;  %v147_v3 = vld [vmem:[#allocation5 + $0x1e8] sm:$0xff] }
  0x40   :  { %312 = vmatprep.subr.mxu0 %v95_v43  ;;  %400 = vmatpush1.msra.mxu1 %v160_v44  ;;  %v212_v4 = vld [vmem:[#allocation5 + $0x3f0] sm:$0xff]  ;;  %v146_v5 = vld [vmem:[#allocation5 + $0x1e0] sm:$0xff]  ;;  %v211_v6 = vld [vmem:[#allocation5 + $0x3e8] sm:$0xff] }
  0x41   :  { %313 = vmatpush1.msra.mxu0 %v94_v45  ;;  %401 = vmatprep.subr.mxu1 %v159_v46  ;;  %v145_v7 = vld [vmem:[#allocation5 + $0x1d8] sm:$0xff]  ;;  %v210_v8 = vld [vmem:[#allocation5 + $0x3e0] sm:$0xff]  ;;  %v144_v9 = vld [vmem:[#allocation5 + $0x1d0] sm:$0xff] }
  0x42   :  { %314 = vmatprep.subr.mxu0 %v93_v47  ;;  %402 = vmatpush1.msra.mxu1 %v158_v48  ;;  %v209_v10 = vld [vmem:[#allocation5 + $0x3d8] sm:$0xff]  ;;  %v143_v11 = vld [vmem:[#allocation5 + $0x1c8] sm:$0xff]  ;;  %v208_v12 = vld [vmem:[#allocation5 + $0x3d0] sm:$0xff] }
  0x43   :  { %315 = vmatpush1.msra.mxu0 %v92_v49  ;;  %403 = vmatprep.subr.mxu1 %v157_v50  ;;  %v142_v13 = vld [vmem:[#allocation5 + $0x1c0] sm:$0xff]  ;;  %v207_v14 = vld [vmem:[#allocation5 + $0x3c8] sm:$0xff]  ;;  %v141_v15 = vld [vmem:[#allocation5 + $0x1b8] sm:$0xff] }
  0x44   :  { %316 = vmatprep.subr.mxu0 %v91_v51  ;;  %404 = vmatpush1.msra.mxu1 %v156_v52  ;;  %v206_v16 = vld [vmem:[#allocation5 + $0x3c0] sm:$0xff]  ;;  %v140_v17 = vld [vmem:[#allocation5 + $0x1b0] sm:$0xff]  ;;  %v205_v18 = vld [vmem:[#allocation5 + $0x3b8] sm:$0xff] }
  0x45   :  { %317 = vmatpush1.msra.mxu0 %v90_v53  ;;  %405 = vmatprep.subr.mxu1 %v155_v54  ;;  %v139_v19 = vld [vmem:[#allocation5 + $0x1a8] sm:$0xff]  ;;  %v204_v20 = vld [vmem:[#allocation5 + $0x3b0] sm:$0xff]  ;;  %v138_v21 = vld [vmem:[#allocation5 + $0x1a0] sm:$0xff] }
  0x46   :  { %318 = vmatprep.subr.mxu0 %v89_v55  ;;  %406 = vmatpush1.msra.mxu1 %v154_v56  ;;  %v203_v22 = vld [vmem:[#allocation5 + $0x3a8] sm:$0xff]  ;;  %v137_v23 = vld [vmem:[#allocation5 + $0x198] sm:$0xff]  ;;  %v202_v24 = vld [vmem:[#allocation5 + $0x3a0] sm:$0xff] }
  0x47   :  { %319 = vmatpush1.msra.mxu0 %v88_v57  ;;  %407 = vmatprep.subr.mxu1 %v153_v58  ;;  %v136_v25 = vld [vmem:[#allocation5 + $0x190] sm:$0xff]  ;;  %v201_v26 = vld [vmem:[#allocation5 + $0x398] sm:$0xff]  ;;  %v135_v27 = vld [vmem:[#allocation5 + $0x188] sm:$0xff] }
  0x48   :  { %320 = vmatprep.subr.mxu0 %v87_v59  ;;  %408 = vmatpush1.msra.mxu1 %v152_v60  ;;  %v200_v28 = vld [vmem:[#allocation5 + $0x390] sm:$0xff]  ;;  %v134_v29 = vld [vmem:[#allocation5 + $0x180] sm:$0xff]  ;;  %v199_v30 = vld [vmem:[#allocation5 + $0x388] sm:$0xff] }
  0x49   :  { %321 = vmatpush1.msra.mxu0 %v86_v61  ;;  %409 = vmatprep.subr.mxu1 %v151_v62  ;;  %v133_v31 = vld [vmem:[#allocation5 + $0x178] sm:$0xff]  ;;  %v198_v32 = vld [vmem:[#allocation5 + $0x380] sm:$0xff]  ;;  %v132_v33 = vld [vmem:[#allocation5 + $0x170] sm:$0xff] }
  0x4a   :  { %322 = vmatprep.subr.mxu0 %v149_v63  ;;  %410 = vmatpush1.msra.mxu1 %v150_v0  ;;  %v197_v34 = vld [vmem:[#allocation5 + $0x378] sm:$0xff]  ;;  %v131_v35 = vld [vmem:[#allocation5 + $0x168] sm:$0xff]  ;;  %v196_v36 = vld [vmem:[#allocation5 + $0x370] sm:$0xff] }
  0x4b   :  { %323 = vmatpush2.msra.mxu0 %v148_v1  ;;  %411 = vmatprep.subr.mxu1 %v213_v2  ;;  %v130_v37 = vld [vmem:[#allocation5 + $0x160] sm:$0xff]  ;;  %v195_v38 = vld [vmem:[#allocation5 + $0x368] sm:$0xff]  ;;  %v129_v39 = vld [vmem:[#allocation5 + $0x158] sm:$0xff] }
  0x4c   :  { %324 = vmatprep.subr.mxu0 %v147_v3  ;;  %412 = vmatpush2.msra.mxu1 %v212_v4  ;;  %v194_v40 = vld [vmem:[#allocation5 + $0x360] sm:$0xff]  ;;  %v128_v41 = vld [vmem:[#allocation5 + $0x150] sm:$0xff]  ;;  %v193_v42 = vld [vmem:[#allocation5 + $0x358] sm:$0xff] }
  0x4d   :  { %325 = vmatpush2.msra.mxu0 %v146_v5  ;;  %413 = vmatprep.subr.mxu1 %v211_v6  ;;  %v127_v43 = vld [vmem:[#allocation5 + $0x148] sm:$0xff]  ;;  %v192_v44 = vld [vmem:[#allocation5 + $0x350] sm:$0xff]  ;;  %v126_v45 = vld [vmem:[#allocation5 + $0x140] sm:$0xff] }
  0x4e   :  { %326 = vmatprep.subr.mxu0 %v145_v7  ;;  %414 = vmatpush2.msra.mxu1 %v210_v8  ;;  %v191_v46 = vld [vmem:[#allocation5 + $0x348] sm:$0xff]  ;;  %v125_v47 = vld [vmem:[#allocation5 + $0x138] sm:$0xff]  ;;  %v190_v48 = vld [vmem:[#allocation5 + $0x340] sm:$0xff] }
  0x4f   :  { %327 = vmatpush2.msra.mxu0 %v144_v9  ;;  %415 = vmatprep.subr.mxu1 %v209_v10  ;;  %v124_v49 = vld [vmem:[#allocation5 + $0x130] sm:$0xff]  ;;  %v189_v50 = vld [vmem:[#allocation5 + $0x338] sm:$0xff]  ;;  %v123_v51 = vld [vmem:[#allocation5 + $0x128] sm:$0xff] }
  0x50   :  { %328 = vmatprep.subr.mxu0 %v143_v11  ;;  %416 = vmatpush2.msra.mxu1 %v208_v12  ;;  %v188_v52 = vld [vmem:[#allocation5 + $0x330] sm:$0xff]  ;;  %v122_v53 = vld [vmem:[#allocation5 + $0x120] sm:$0xff]  ;;  %v187_v54 = vld [vmem:[#allocation5 + $0x328] sm:$0xff] }
  0x51   :  { %329 = vmatpush2.msra.mxu0 %v142_v13  ;;  %417 = vmatprep.subr.mxu1 %v207_v14  ;;  %v121_v55 = vld [vmem:[#allocation5 + $0x118] sm:$0xff]  ;;  %v186_v56 = vld [vmem:[#allocation5 + $0x320] sm:$0xff]  ;;  %v120_v57 = vld [vmem:[#allocation5 + $0x110] sm:$0xff] }
  0x52   :  { %330 = vmatprep.subr.mxu0 %v141_v15  ;;  %418 = vmatpush2.msra.mxu1 %v206_v16  ;;  %v185_v58 = vld [vmem:[#allocation5 + $0x318] sm:$0xff]  ;;  %v119_v59 = vld [vmem:[#allocation5 + $0x108] sm:$0xff]  ;;  %v118_v61 = vld [vmem:[#allocation5 + $0x100] sm:$0xff] }
  0x53   :  { %331 = vmatpush2.msra.mxu0 %v140_v17  ;;  %419 = vmatprep.subr.mxu1 %v205_v18  ;;  %v63_v60 = vld [vmem:[#allocation2 + $0x8] sm:$0xff]  ;;  %v184_v62 = vld [vmem:[#allocation5 + $0x310] sm:$0xff]  ;;  %v62_v63 = vld [vmem:[#allocation2] sm:$0xff] }
  0x54   :  { %332 = vmatprep.subr.mxu0 %v139_v19  ;;  %420 = vmatpush2.msra.mxu1 %v204_v20  ;;  %v183_v0 = vld [vmem:[#allocation5 + $0x308] sm:$0xff]  ;;  %v245_v1 = vld [vmem:[#allocation5 + $0x4f8] sm:$0xff]  ;;  %v182_v2 = vld [vmem:[#allocation5 + $0x300] sm:$0xff] }
  0x55   :  { %333 = vmatpush2.msra.mxu0 %v138_v21  ;;  %421 = vmatprep.subr.mxu1 %v203_v22  ;;  %v65_v3 = vld [vmem:[#allocation2 + $0x18] sm:$0xff]  ;;  %v244_v4 = vld [vmem:[#allocation5 + $0x4f0] sm:$0xff]  ;;  %v243_v6 = vld [vmem:[#allocation5 + $0x4e8] sm:$0xff] }
  0x56   :  { %334 = vmatprep.subr.mxu0 %v137_v23  ;;  %422 = vmatpush2.msra.mxu1 %v202_v24  ;;  %v64_v5 = vld [vmem:[#allocation2 + $0x10] sm:$0xff]  ;;  %v242_v7 = vld [vmem:[#allocation5 + $0x4e0] sm:$0xff]  ;;  %v69_v8 = vld [vmem:[#allocation2 + $0x38] sm:$0xff] }
  0x57   :  { %335 = vmatpush2.msra.mxu0 %v136_v25  ;;  %423 = vmatprep.subr.mxu1 %v201_v26  ;;  %v241_v9 = vld [vmem:[#allocation5 + $0x4d8] sm:$0xff]  ;;  %v68_v10 = vld [vmem:[#allocation2 + $0x30] sm:$0xff]  ;;  %v71_v12 = vld [vmem:[#allocation2 + $0x48] sm:$0xff] }
  0x58   :  { %336 = vmatprep.subr.mxu0 %v135_v27  ;;  %424 = vmatpush2.msra.mxu1 %v200_v28  ;;  %v240_v11 = vld [vmem:[#allocation5 + $0x4d0] sm:$0xff]  ;;  %v239_v13 = vld [vmem:[#allocation5 + $0x4c8] sm:$0xff]  ;;  %v70_v14 = vld [vmem:[#allocation2 + $0x40] sm:$0xff] }
  0x59   :  { %337 = vmatpush2.msra.mxu0 %v134_v29  ;;  %425 = vmatprep.subr.mxu1 %v199_v30  ;;  %v238_v15 = vld [vmem:[#allocation5 + $0x4c0] sm:$0xff]  ;;  %v75_v16 = vld [vmem:[#allocation2 + $0x68] sm:$0xff]  ;;  %v237_v17 = vld [vmem:[#allocation5 + $0x4b8] sm:$0xff] }
  0x5a   :  { %338 = vmatprep.subr.mxu0 %v133_v31  ;;  %426 = vmatpush2.msra.mxu1 %v198_v32  ;;  %v74_v18 = vld [vmem:[#allocation2 + $0x60] sm:$0xff]  ;;  %v236_v19 = vld [vmem:[#allocation5 + $0x4b0] sm:$0xff]  ;;  %v77_v20 = vld [vmem:[#allocation2 + $0x78] sm:$0xff] }
  0x5b   :  { %339 = vmatpush2.msra.mxu0 %v132_v33  ;;  %427 = vmatprep.subr.mxu1 %v197_v34  ;;  %v235_v21 = vld [vmem:[#allocation5 + $0x4a8] sm:$0xff]  ;;  %v76_v22 = vld [vmem:[#allocation2 + $0x70] sm:$0xff]  ;;  %v234_v23 = vld [vmem:[#allocation5 + $0x4a0] sm:$0xff] }
  0x5c   :  { %340 = vmatprep.subr.mxu0 %v131_v35  ;;  %428 = vmatpush2.msra.mxu1 %v196_v36  ;;  %v81_v24 = vld [vmem:[#allocation2 + $0x98] sm:$0xff]  ;;  %v80_v26 = vld [vmem:[#allocation2 + $0x90] sm:$0xff]  ;;  %v83_v28 = vld [vmem:[#allocation2 + $0xa8] sm:$0xff] }
  0x5d   :  { %341 = vmatpush2.msra.mxu0 %v130_v37  ;;  %429 = vmatprep.subr.mxu1 %v195_v38  ;;  %v233_v25 = vld [vmem:[#allocation5 + $0x498] sm:$0xff]  ;;  %v232_v27 = vld [vmem:[#allocation5 + $0x490] sm:$0xff]  ;;  %v231_v29 = vld [vmem:[#allocation5 + $0x488] sm:$0xff] }
  0x5e   :  { %342 = vmatprep.subr.mxu0 %v129_v39  ;;  %430 = vmatpush2.msra.mxu1 %v194_v40  ;;  %v82_v30 = vld [vmem:[#allocation2 + $0xa0] sm:$0xff]  ;;  %v67_v32 = vld [vmem:[#allocation2 + $0x28] sm:$0xff]  ;;  %v229_v33 = vld [vmem:[#allocation5 + $0x478] sm:$0xff] }
  0x5f   :  { %343 = vmatpush2.msra.mxu0 %v128_v41  ;;  %431 = vmatprep.subr.mxu1 %v193_v42  ;;  %v230_v31 = vld [vmem:[#allocation5 + $0x480] sm:$0xff]  ;;  %v228_v34 = vld [vmem:[#allocation5 + $0x470] sm:$0xff]  ;;  %v227_v35 = vld [vmem:[#allocation5 + $0x468] sm:$0xff] }
  0x60   :  { %344 = vmatprep.subr.mxu0 %v127_v43  ;;  %432 = vmatpush2.msra.mxu1 %v192_v44  ;;  %v226_v36 = vld [vmem:[#allocation5 + $0x460] sm:$0xff]  ;;  %v225_v37 = vld [vmem:[#allocation5 + $0x458] sm:$0xff]  ;;  %v224_v38 = vld [vmem:[#allocation5 + $0x450] sm:$0xff] }
  0x61   :  { %345 = vmatpush2.msra.mxu0 %v126_v45  ;;  %433 = vmatprep.subr.mxu1 %v191_v46  ;;  %v223_v39 = vld [vmem:[#allocation5 + $0x448] sm:$0xff]  ;;  %v222_v40 = vld [vmem:[#allocation5 + $0x440] sm:$0xff]  ;;  %v221_v41 = vld [vmem:[#allocation5 + $0x438] sm:$0xff] }
  0x62   :  { %346 = vmatprep.subr.mxu0 %v125_v47  ;;  %434 = vmatpush2.msra.mxu1 %v190_v48  ;;  %v220_v42 = vld [vmem:[#allocation5 + $0x430] sm:$0xff]  ;;  %v219_v43 = vld [vmem:[#allocation5 + $0x428] sm:$0xff]  ;;  %v218_v44 = vld [vmem:[#allocation5 + $0x420] sm:$0xff] }
  0x63   :  { %347 = vmatpush2.msra.mxu0 %v124_v49  ;;  %435 = vmatprep.subr.mxu1 %v189_v50  ;;  %v217_v45 = vld [vmem:[#allocation5 + $0x418] sm:$0xff]  ;;  %v216_v46 = vld [vmem:[#allocation5 + $0x410] sm:$0xff]  ;;  %v215_v47 = vld [vmem:[#allocation5 + $0x408] sm:$0xff] }
  0x64   :  { %348 = vmatprep.subr.mxu0 %v123_v51  ;;  %436 = vmatpush2.msra.mxu1 %v188_v52  ;;  %v214_v48 = vld [vmem:[#allocation5 + $0x400] sm:$0xff]  ;;  %v277_v49 = vld [vmem:[#allocation5 + $0x5f8] sm:$0xff]  ;;  %v276_v50 = vld [vmem:[#allocation5 + $0x5f0] sm:$0xff] }
  0x65   :  { %349 = vmatpush2.msra.mxu0 %v122_v53  ;;  %437 = vmatprep.subr.mxu1 %v187_v54  ;;  %v275_v51 = vld [vmem:[#allocation5 + $0x5e8] sm:$0xff]  ;;  %v274_v52 = vld [vmem:[#allocation5 + $0x5e0] sm:$0xff]  ;;  %v273_v53 = vld [vmem:[#allocation5 + $0x5d8] sm:$0xff] }
  0x66   :  { %350 = vmatprep.subr.mxu0 %v121_v55  ;;  %438 = vmatpush2.msra.mxu1 %v186_v56  ;;  %v272_v54 = vld [vmem:[#allocation5 + $0x5d0] sm:$0xff]  ;;  %v271_v55 = vld [vmem:[#allocation5 + $0x5c8] sm:$0xff]  ;;  %v270_v56 = vld [vmem:[#allocation5 + $0x5c0] sm:$0xff] }
  0x67   :  { %351 = vmatpush2.msra.mxu0 %v120_v57  ;;  %439 = vmatprep.subr.mxu1 %v185_v58  ;;  %v269_v57 = vld [vmem:[#allocation5 + $0x5b8] sm:$0xff]  ;;  %v268_v58 = vld [vmem:[#allocation5 + $0x5b0] sm:$0xff] }
  0x68   :  { %352 = vmatprep.subr.mxu0 %v119_v59  ;;  %354 = vmatprep.mubr.f32.mxu0 %v63_v60  ;;  %v267_v59 = vld [vmem:[#allocation5 + $0x5a8] sm:$0xff]  ;;  %v266_v60 = vld [vmem:[#allocation5 + $0x5a0] sm:$0xff] }
  0x69   :  { %353 = vmatpush2.msra.mxu0 %v118_v61  ;;  %440 = vmatpush2.msra.mxu1 %v184_v62  ;;  %v265_v61 = vld [vmem:[#allocation5 + $0x598] sm:$0xff]  ;;  %v264_v62 = vld [vmem:[#allocation5 + $0x590] sm:$0xff] }
  0x6a   :  { %355 = vmatmul.mubr.f32.vlgmr.msra.gmra.mxu0 %v62_v63  ;;  %441 = vmatprep.subr.mxu1 %v183_v0  ;;  %v263_v63 = vld [vmem:[#allocation5 + $0x588] sm:$0xff]  ;;  %v262_v0 = vld [vmem:[#allocation5 + $0x580] sm:$0xff] }
  0x6b   :  { %468 = vmatprep.subr.mxu0 %v245_v1  ;;  %442 = vmatpush2.msra.mxu1 %v182_v2  ;;  %v261_v1 = vld [vmem:[#allocation5 + $0x578] sm:$0xff]  ;;  %v260_v2 = vld [vmem:[#allocation5 + $0x570] sm:$0xff] }
  0x6c   :  { %443 = vmatprep.mubr.f32.mxu1 %v65_v3  ;;  %469 = vmatpush1.msra.mxu0 %v244_v4  ;;  %v259_v3 = vld [vmem:[#allocation5 + $0x568] sm:$0xff]  ;;  %v258_v4 = vld [vmem:[#allocation5 + $0x560] sm:$0xff] }
  0x6d   :  { %444 = vmatmul.mubr.f32.vlgmr.msra.gmra.mxu1 %v64_v5  ;;  %470 = vmatprep.subr.mxu0 %v243_v6  ;;  %v257_v5 = vld [vmem:[#allocation5 + $0x558] sm:$0xff]  ;;  %v256_v6 = vld [vmem:[#allocation5 + $0x550] sm:$0xff] }
  0x6e   :  { %471 = vmatpush1.msra.mxu0 %v242_v7  ;;  %360 = vmatprep.mubr.f32.mxu0 %v69_v8  ;;  %v255_v7 = vld [vmem:[#allocation5 + $0x548] sm:$0xff]  ;;  %v254_v8 = vld [vmem:[#allocation5 + $0x540] sm:$0xff] }
  0x6f   :  { %472 = vmatprep.subr.mxu0 %v241_v9  ;;  %361 = vmatmul.mubr.f32.gmra.mxu0 %v68_v10  ;;  %v253_v9 = vld [vmem:[#allocation5 + $0x538] sm:$0xff]  ;;  %v252_v10 = vld [vmem:[#allocation5 + $0x530] sm:$0xff] }
  0x70   :  { %473 = vmatpush1.msra.mxu0 %v240_v11  ;;  %449 = vmatprep.mubr.f32.mxu1 %v71_v12  ;;  %v251_v11 = vld [vmem:[#allocation5 + $0x528] sm:$0xff]  ;;  %v250_v12 = vld [vmem:[#allocation5 + $0x520] sm:$0xff] }
  0x71   :  { %474 = vmatprep.subr.mxu0 %v239_v13  ;;  %450 = vmatmul.mubr.f32.gmra.mxu1 %v70_v14  ;;  %v249_v13 = vld [vmem:[#allocation5 + $0x518] sm:$0xff]  ;;  %v248_v14 = vld [vmem:[#allocation5 + $0x510] sm:$0xff] }
  0x72   :  { %475 = vmatpush1.msra.mxu0 %v238_v15  ;;  %366 = vmatprep.mubr.f32.mxu0 %v75_v16  ;;  %v247_v15 = vld [vmem:[#allocation5 + $0x508] sm:$0xff]  ;;  %v246_v16 = vld [vmem:[#allocation5 + $0x500] sm:$0xff] }
  0x73   :  { %476 = vmatprep.subr.mxu0 %v237_v17  ;;  %367 = vmatmul.mubr.f32.gmra.mxu0 %v74_v18  ;;  %v66_v17 = vld [vmem:[#allocation2 + $0x20] sm:$0xff]  ;;  %v73_v18 = vld [vmem:[#allocation2 + $0x58] sm:$0xff] }
  0x74   :  { %477 = vmatpush1.msra.mxu0 %v236_v19  ;;  %455 = vmatprep.mubr.f32.mxu1 %v77_v20  ;;  %v72_v19 = vld [vmem:[#allocation2 + $0x50] sm:$0xff]  ;;  %v79_v20 = vld [vmem:[#allocation2 + $0x88] sm:$0xff] }
  0x75   :  { %478 = vmatprep.subr.mxu0 %v235_v21  ;;  %456 = vmatmul.mubr.f32.gmra.mxu1 %v76_v22  ;;  %v78_v21 = vld [vmem:[#allocation2 + $0x80] sm:$0xff]  ;;  %v596_v22 = vld [vmem:[#allocation7 + $0xf8] sm:$0xff] }
  0x76   :  { %479 = vmatpush1.msra.mxu0 %v234_v23  ;;  %372 = vmatprep.mubr.f32.mxu0 %v81_v24  ;;  %v580_v23 = vld [vmem:[#allocation7 + $0x78] sm:$0xff]  ;;  %v595_v24 = vld [vmem:[#allocation7 + $0xf0] sm:$0xff] }
  0x77   :  { %480 = vmatprep.subr.mxu0 %v233_v25  ;;  %373 = vmatmul.mubr.f32.gmra.mxu0 %v80_v26  ;;  %v85_v25 = vld [vmem:[#allocation2 + $0xb8] sm:$0xff]  ;;  %v579_v26 = vld [vmem:[#allocation7 + $0x70] sm:$0xff] }
  0x78   :  { %481 = vmatpush1.msra.mxu0 %v232_v27  ;;  %461 = vmatprep.mubr.f32.mxu1 %v83_v28  ;;  %v594_v27 = vld [vmem:[#allocation7 + $0xe8] sm:$0xff] }
  0x79   :  { %482 = vmatprep.subr.mxu0 %v231_v29  ;;  %462 = vmatmul.mubr.f32.gmra.mxu1 %v82_v30  ;;  %v578_v28 = vld [vmem:[#allocation7 + $0x68] sm:$0xff]  ;;  %v84_v29 = vld [vmem:[#allocation2 + $0xb0] sm:$0xff]  ;;  %v593_v30 = vld [vmem:[#allocation7 + $0xe0] sm:$0xff] }
  0x7a   :  { %483 = vmatpush1.msra.mxu0 %v230_v31  ;;  %532 = vmatprep.mubr.f32.mxu0 %v67_v32  ;;  %v577_v31 = vld [vmem:[#allocation7 + $0x60] sm:$0xff]  ;;  %v592_v32 = vld [vmem:[#allocation7 + $0xd8] sm:$0xff] }
  0x7b   :  { %484 = vmatprep.subr.mxu0 %v229_v33  ;;  %770 = vmatprep.subr.mxu1 %v596_v22  ;;  %v576_v33 = vld [vmem:[#allocation7 + $0x58] sm:$0xff] }
  0x7c   :  { %485 = vmatpush1.msra.mxu0 %v228_v34  ;;  %771 = vmatpush3.msra.mxu1 %v580_v23  ;;  %v591_v34 = vld [vmem:[#allocation7 + $0xd0] sm:$0xff] }
  0x7d   :  { %486 = vmatprep.subr.mxu0 %v227_v35  ;;  %772 = vmatprep.subr.mxu1 %v595_v24  ;;  %v575_v35 = vld [vmem:[#allocation7 + $0x50] sm:$0xff] }
  0x7e   :  { %487 = vmatpush1.msra.mxu0 %v226_v36  ;;  %773 = vmatpush3.msra.mxu1 %v579_v26  ;;  %v590_v36 = vld [vmem:[#allocation7 + $0xc8] sm:$0xff] }
  0x7f   :  { %488 = vmatprep.subr.mxu0 %v225_v37  ;;  %774 = vmatprep.subr.mxu1 %v594_v27  ;;  %v574_v37 = vld [vmem:[#allocation7 + $0x48] sm:$0xff] }
  0x80   :  { %489 = vmatpush1.msra.mxu0 %v224_v38  ;;  %775 = vmatpush3.msra.mxu1 %v578_v28  ;;  %v589_v38 = vld [vmem:[#allocation7 + $0xc0] sm:$0xff] }
  0x81   :  { %490 = vmatprep.subr.mxu0 %v223_v39  ;;  %776 = vmatprep.subr.mxu1 %v593_v30  ;;  %v573_v39 = vld [vmem:[#allocation7 + $0x40] sm:$0xff] }
  0x82   :  { %491 = vmatpush1.msra.mxu0 %v222_v40  ;;  %777 = vmatpush3.msra.mxu1 %v577_v31  ;;  %v588_v40 = vld [vmem:[#allocation7 + $0xb8] sm:$0xff] }
  0x83   :  { %492 = vmatprep.subr.mxu0 %v221_v41  ;;  %778 = vmatprep.subr.mxu1 %v592_v32  ;;  %v572_v41 = vld [vmem:[#allocation7 + $0x38] sm:$0xff] }
  0x84   :  { %493 = vmatpush1.msra.mxu0 %v220_v42  ;;  %779 = vmatpush3.msra.mxu1 %v576_v33  ;;  %v587_v42 = vld [vmem:[#allocation7 + $0xb0] sm:$0xff] }
  0x85   :  { %494 = vmatprep.subr.mxu0 %v219_v43  ;;  %780 = vmatprep.subr.mxu1 %v591_v34  ;;  %v571_v43 = vld [vmem:[#allocation7 + $0x30] sm:$0xff] }
  0x86   :  { %495 = vmatpush1.msra.mxu0 %v218_v44  ;;  %781 = vmatpush3.msra.mxu1 %v575_v35  ;;  %v586_v44 = vld [vmem:[#allocation7 + $0xa8] sm:$0xff] }
  0x87   :  { %496 = vmatprep.subr.mxu0 %v217_v45  ;;  %782 = vmatprep.subr.mxu1 %v590_v36  ;;  %v570_v45 = vld [vmem:[#allocation7 + $0x28] sm:$0xff] }
  0x88   :  { %497 = vmatpush1.msra.mxu0 %v216_v46  ;;  %783 = vmatpush3.msra.mxu1 %v574_v37  ;;  %v585_v46 = vld [vmem:[#allocation7 + $0xa0] sm:$0xff] }
  0x89   :  { %498 = vmatprep.subr.mxu0 %v215_v47  ;;  %784 = vmatprep.subr.mxu1 %v589_v38  ;;  %v569_v47 = vld [vmem:[#allocation7 + $0x20] sm:$0xff] }
  0x8a   :  { %499 = vmatpush1.msra.mxu0 %v214_v48  ;;  %785 = vmatpush3.msra.mxu1 %v573_v39  ;;  %v584_v48 = vld [vmem:[#allocation7 + $0x98] sm:$0xff] }
  0x8b   :  { %500 = vmatprep.subr.mxu0 %v277_v49  ;;  %786 = vmatprep.subr.mxu1 %v588_v40  ;;  %v568_v49 = vld [vmem:[#allocation7 + $0x18] sm:$0xff] }
  0x8c   :  { %501 = vmatpush2.msra.mxu0 %v276_v50  ;;  %787 = vmatpush3.msra.mxu1 %v572_v41  ;;  %v583_v50 = vld [vmem:[#allocation7 + $0x90] sm:$0xff] }
  0x8d   :  { %502 = vmatprep.subr.mxu0 %v275_v51  ;;  %788 = vmatprep.subr.mxu1 %v587_v42  ;;  %v567_v51 = vld [vmem:[#allocation7 + $0x10] sm:$0xff] }
  0x8e   :  { %503 = vmatpush2.msra.mxu0 %v274_v52  ;;  %789 = vmatpush3.msra.mxu1 %v571_v43  ;;  %v582_v52 = vld [vmem:[#allocation7 + $0x88] sm:$0xff] }
  0x8f   :  { %504 = vmatprep.subr.mxu0 %v273_v53  ;;  %790 = vmatprep.subr.mxu1 %v586_v44  ;;  %v566_v53 = vld [vmem:[#allocation7 + $0x8] sm:$0xff] }
  0x90   :  { %505 = vmatpush2.msra.mxu0 %v272_v54  ;;  %791 = vmatpush3.msra.mxu1 %v570_v45  ;;  %v581_v54 = vld [vmem:[#allocation7 + $0x80] sm:$0xff] }
  0x91   :  { %506 = vmatprep.subr.mxu0 %v271_v55  ;;  %792 = vmatprep.subr.mxu1 %v585_v46  ;;  %v565_v55 = vld [vmem:[#allocation7] sm:$0xff] }
  0x92   :  { %507 = vmatpush2.msra.mxu0 %v270_v56  ;;  %793 = vmatpush3.msra.mxu1 %v569_v47 }
  0x93   :  { %508 = vmatprep.subr.mxu0 %v269_v57  ;;  %794 = vmatprep.subr.mxu1 %v584_v48 }
  0x94   :  { %509 = vmatpush2.msra.mxu0 %v268_v58  ;;  %795 = vmatpush3.msra.mxu1 %v568_v49 }
  0x95   :  { %510 = vmatprep.subr.mxu0 %v267_v59  ;;  %796 = vmatprep.subr.mxu1 %v583_v50  ;;  %v280_v59 = vlaneseq }
  0x96   :  { %511 = vmatpush2.msra.mxu0 %v266_v60  ;;  %797 = vmatpush3.msra.mxu1 %v567_v51 }
  0x97   :  { %512 = vmatprep.subr.mxu0 %v265_v61  ;;  %798 = vmatprep.subr.mxu1 %v582_v52  ;;  %v970_v61 = vshrl.u32 %v280_v59, 7 }
  0x98   :  { %513 = vmatpush2.msra.mxu0 %v264_v62  ;;  %799 = vmatpush3.msra.mxu1 %v566_v53 }
  0x99   :  { %514 = vmatprep.subr.mxu0 %v263_v63  ;;  %800 = vmatprep.subr.mxu1 %v581_v54 }
  0x9a   :  { %515 = vmatpush2.msra.mxu0 %v262_v0  ;;  %801 = vmatpush3.msra.mxu1 %v565_v55  ;;  %v282_v0 = vsub.s32 0, %v970_v61  ;;  %v597_v55 = vld [vmem:[%s999_s4] sm:$0x7]  ;;  %s927_s4 = smov [#allocation8]  }
  0x9b   :  { %516 = vmatprep.subr.mxu0 %v261_v1  ;;  %s757_s14 = sshll.u32 %s927_s4, 4  ;;  %s758_s14 = int_to_ptr.vmem [resolvable:$true] %s757_s14 }
  0x9c   :  { %517 = vmatpush2.msra.mxu0 %v260_v2  ;;  %v278_v2 = vld [vmem:[%s997_s2] sm:$0x3]  ;;  %s892_s15 = scalar_lea.vmem %s758_s14, 512  ;;  %p897_p2 = scmp.lt.s32.totalorder %s758_s14, %s758_s14 }
  0x9d   :  { %518 = vmatprep.subr.mxu0 %v259_v3  ;;  %v286_v3 = vsub.s32 1, %v970_v61  ;;  %p893_p1 = scmp.ne.s32.totalorder %s758_s14, %s892_s15  ;;  %p898_p3 = scmp.lt.s32.totalorder %s892_s15, %s892_s15 }
  0x9e   :  { %519 = vmatpush2.msra.mxu0 %v258_v4 }
  0x9f   :  { %520 = vmatprep.subr.mxu0 %v257_v5  ;;  %p899_p4 = por %p898_p3, %p897_p2 }
  0xa0   :  { %521 = vmatpush2.msra.mxu0 %v256_v6  ;;  %v283_v6 = vrot.slane %v278_v2, %v282_v0 }
  0xa1   :  { %522 = vmatprep.subr.mxu0 %v255_v7  ;;  %v287_v7 = vrot.slane %v278_v2, %v286_v3  ;;  %p900_p5 = pnand %p899_p4, %p893_p1 }
  0xa2   :  { %523 = vmatpush2.msra.mxu0 %v254_v8 }
  0xa3   :  { %524 = vmatprep.subr.mxu0 %v253_v9 }
  0xa4   :  { %525 = vmatpush2.msra.mxu0 %v252_v10 }
  0xa5   :  { %526 = vmatprep.subr.mxu0 %v251_v11 }
  0xa6   :  { %527 = vmatpush2.msra.mxu0 %v250_v12 }
  0xa7   :  { %528 = vmatprep.subr.mxu0 %v249_v13 }
  0xa8   :  { %529 = vmatpush2.msra.mxu0 %v248_v14 }
  0xa9   :  { %530 = vmatprep.subr.mxu0 %v247_v15 }
  0xaa   :  { %531 = vmatpush2.msra.mxu0 %v246_v16 }
  0xab   :  { %533 = vmatmul.mubr.f32.vlgmr.msra.gmra.mxu0 %v66_v17 }
  0xac   :  { %538 = vmatprep.mubr.f32.mxu0 %v73_v18 }
  0xaf   :  { %539 = vmatmul.mubr.f32.gmra.mxu0 %v72_v19 }
  0xb0   :  { %544 = vmatprep.mubr.f32.mxu0 %v79_v20 }
  0xb3   :  { %545 = vmatmul.mubr.f32.gmra.mxu0 %v78_v21 }
  0xb4   :  { %550 = vmatprep.mubr.f32.mxu0 %v85_v25 }
  0xb7   :  { %551 = vmatmul.mubr.f32.gmra.mxu0 %v84_v29 }
 0x12a   :  { %v356_v56 = vpop.f32.mrf.mxu0 }
 0x12b   :  { %v357_v10 = vadd.f32 %v356_v56, %v283_v6 }
 0x12c   :  { %v358_v57 = vpop.f32.mrf.mxu0 }
 0x12d   :  { %v445_v62 = vpop.f32.mrf.mxu1  ;;  %v359_v11 = vadd.f32 %v358_v57, %v287_v7  ;;  %v601_v57 = vrot.slane %v597_v55, %v282_v0 }
 0x12e   :  { %v446_v14 = vadd.f32 %v445_v62, %v357_v10 }
 0x12f   :  { %v362_v58 = vpop.f32.mrf.mxu0  ;;  %v447_v1 = vpop.f32.mrf.mxu1 }
 0x130   :  { %v363_v15 = vadd.f32 %v362_v58, %v283_v6  ;;  %v448_v17 = vadd.f32 %v447_v1, %v359_v11 }
 0x131   :  { %v364_v60 = vpop.f32.mrf.mxu0  ;;  %v451_v4 = vpop.f32.mrf.mxu1 }
 0x132   :  { %v365_v18 = vadd.f32 %v364_v60, %v287_v7  ;;  %v452_v23 = vadd.f32 %v451_v4, %v363_v15 }
 0x133   :  { %v368_v63 = vpop.f32.mrf.mxu0  ;;  %v453_v8 = vpop.f32.mrf.mxu1 }
 0x134   :  { %v369_v24 = vadd.f32 %v368_v63, %v283_v6  ;;  %v454_v26 = vadd.f32 %v453_v8, %v365_v18 }
 0x135   :  { %v370_v5 = vpop.f32.mrf.mxu0  ;;  %v457_v12 = vpop.f32.mrf.mxu1 }
 0x136   :  { %v371_v27 = vadd.f32 %v370_v5, %v287_v7  ;;  %v458_v34 = vadd.f32 %v457_v12, %v369_v24 }
 0x137   :  { %v374_v9 = vpop.f32.mrf.mxu0  ;;  %v459_v19 = vpop.f32.mrf.mxu1 }
 0x138   :  { %v375_v35 = vadd.f32 %v374_v9, %v283_v6  ;;  %v460_v37 = vadd.f32 %v459_v19, %v371_v27 }
 0x139   :  { %v376_v13 = vpop.f32.mrf.mxu0  ;;  %v463_v29 = vpop.f32.mrf.mxu1 }
 0x13a   :  { %v377_v38 = vadd.f32 %v376_v13, %v287_v7  ;;  %v464_v45 = vadd.f32 %v463_v29, %v375_v35 }
 0x13b   :  { %v465_v40 = vpop.f32.mrf.mxu1 }
 0x13c   :  { %v466_v47 = vadd.f32 %v465_v40, %v377_v38  ;;  %v742_v38 = vsub.s32 2, %v970_v61  ;;  %v735_v40 = vrot.slane %v597_v55, %v286_v3 }
 0x16b   :  { %v534_v16 = vpop.f32.mrf.mxu0 }
 0x16c   :  { %v535_v20 = vadd.f32 %v534_v16, %v446_v14 }
 0x16d   :  { %v536_v21 = vpop.f32.mrf.mxu0 }
 0x16e   :  { %v537_v22 = vadd.f32 %v536_v21, %v448_v17  ;;  %v557_v30 = vmax.f32 %v535_v20, 0.0 }
 0x16f   :  { %v540_v25 = vpop.f32.mrf.mxu0 }
 0x170   :  { %v558_v28 = vmax.f32 %v537_v22, 0.0  ;;  %v541_v31 = vadd.f32 %v540_v25, %v452_v23 }
 0x171   :  { %v542_v32 = vpop.f32.mrf.mxu0 }
 0x172   :  { %v543_v33 = vadd.f32 %v542_v32, %v454_v26  ;;  %666 = vmatprep.mubr.f32.mxu1 %v558_v28  ;;  %v559_v41 = vmax.f32 %v541_v31, 0.0 }
 0x173   :  { %v546_v36 = vpop.f32.mrf.mxu0  ;;  %667 = vmatmul.mubr.f32.vlgmr.msra.gmra.mxu1 %v557_v30 }
 0x174   :  { %v560_v39 = vmax.f32 %v543_v33, 0.0  ;;  %v547_v42 = vadd.f32 %v546_v36, %v458_v34 }
 0x175   :  { %v548_v43 = vpop.f32.mrf.mxu0 }
 0x176   :  { %v549_v44 = vadd.f32 %v548_v43, %v460_v37  ;;  %671 = vmatprep.mubr.f32.mxu1 %v560_v39  ;;  %v561_v49 = vmax.f32 %v547_v42, 0.0  ;;  %v743_v42 = vrot.slane %v597_v55, %v742_v38 }
 0x177   :  { %v552_v46 = vpop.f32.mrf.mxu0  ;;  %672 = vmatmul.mubr.f32.gmra.mxu1 %v559_v41 }
 0x178   :  { %v562_v48 = vmax.f32 %v549_v44, 0.0  ;;  %v553_v50 = vadd.f32 %v552_v46, %v464_v45 }
 0x179   :  { %v554_v51 = vpop.f32.mrf.mxu0 }
 0x17a   :  { %v555_v52 = vadd.f32 %v554_v51, %v466_v47  ;;  %676 = vmatprep.mubr.f32.mxu1 %v562_v48  ;;  %v563_v54 = vmax.f32 %v553_v50, 0.0 }
 0x17b   :  { %677 = vmatmul.mubr.f32.gmra.mxu1 %v561_v49 }
 0x17c   :  { %v564_v53 = vmax.f32 %v555_v52, 0.0 }
 0x17e   :  { %681 = vmatprep.mubr.f32.mxu1 %v564_v53 }
 0x17f   :  { %682 = vmatmul.mubr.f32.gmra.mxu1 %v563_v54 }
 0x233   :  { %v802_v56 = vpop.f32.mrf.mxu1 }
 0x235   :  { %v803_v58 = vpop.f32.mrf.mxu1 }
 0x236   :  { %v804_v59 = vadd.f32 %v803_v58, %v802_v56 }
 0x237   :  { %v805_v60 = vpop.f32.mrf.mxu1 }
 0x238   :  { %v669_v62 = vadd.f32 %v804_v59, %v601_v57 }
 0x239   :  { %v806_v63 = vpop.f32.mrf.mxu1 }
 0x23a   :  { %v807_v1 = vadd.f32 %v806_v63, %v805_v60  ;;  %687 = vadd.xlane.f32.xlu0 %v669_v62 }
 0x23b   :  { %v808_v2 = vpop.f32.mrf.mxu1 }
 0x23c   :  { %v674_v4 = vadd.f32 %v807_v1, %v601_v57 }
 0x23d   :  { %v809_v5 = vpop.f32.mrf.mxu1 }
 0x23e   :  { %v810_v6 = vadd.f32 %v809_v5, %v808_v2  ;;  %689 = vadd.xlane.f32.xlu0 %v674_v4 }
 0x23f   :  { %v811_v7 = vpop.f32.mrf.mxu1 }
 0x240   :  { %v679_v8 = vadd.f32 %v810_v6, %v601_v57 }
 0x241   :  { %v812_v9 = vpop.f32.mrf.mxu1 }
 0x242   :  { %v813_v10 = vadd.f32 %v812_v9, %v811_v7  ;;  %691 = vadd.xlane.f32.xlu1 %v679_v8 }
 0x244   :  { %v684_v11 = vadd.f32 %v813_v10, %v601_v57 }
 0x246   :  { %693 = vadd.xlane.f32.xlu1 %v684_v11 }
 0x2c3   :  { %v688_v0 = vpop.xlane.xlu0 %687 }
 0x2c4   :  { %v696_v12 = vmul.f32 0.0078125, %v688_v0 }
 0x2c6   :  { %v700_v13 = vsub.f32 %v669_v62, %v696_v12 }
 0x2c7   :  { %v690_v14 = vpop.xlane.xlu0 %689 }
 0x2c8   :  { %v697_v15 = vmul.f32 0.0078125, %v690_v14  ;;  %v704_v16 = vmul.f32 %v700_v13, %v700_v13 }
 0x2ca   :  { %v701_v17 = vsub.f32 %v674_v4, %v697_v15  ;;  %708 = vadd.xlane.f32.xlu0 %v704_v16 }
 0x2cb   :  { %v692_v18 = vpop.xlane.xlu1 %691 }
 0x2cc   :  { %v698_v19 = vmul.f32 0.0078125, %v692_v18  ;;  %v705_v20 = vmul.f32 %v701_v17, %v701_v17 }
 0x2ce   :  { %v702_v21 = vsub.f32 %v679_v8, %v698_v19  ;;  %710 = vadd.xlane.f32.xlu1 %v705_v20 }
 0x2cf   :  { %v694_v22 = vpop.xlane.xlu1 %693 }
 0x2d0   :  { %v699_v23 = vmul.f32 0.0078125, %v694_v22  ;;  %v706_v24 = vmul.f32 %v702_v21, %v702_v21 }
 0x2d2   :  { %v703_v25 = vsub.f32 %v684_v11, %v699_v23  ;;  %712 = vadd.xlane.f32.xlu0 %v706_v24 }
 0x2d4   :  { %v707_v26 = vmul.f32 %v703_v25, %v703_v25 }
 0x2d6   :  { %714 = vadd.xlane.f32.xlu1 %v707_v26 }
 0x353   :  { %v709_v27 = vpop.xlane.xlu0 %708 }
 0x354   :  { %v716_v28 = vmul.f32 0.0078125, %v709_v27 }
 0x356   :  { %v720_v29 = vadd.f32 1e-05, %v716_v28 }
 0x357   :  { %v711_v30 = vpop.xlane.xlu1 %710 }
 0x358   :  { %824 = vrsqrt.f32 %v720_v29  ;;  %v717_v31 = vmul.f32 0.0078125, %v711_v30 }
 0x35a   :  { %v721_v32 = vadd.f32 1e-05, %v717_v31 }
 0x35b   :  { %v713_v33 = vpop.xlane.xlu0 %712 }
 0x35c   :  { %826 = vrsqrt.f32 %v721_v32  ;;  %v718_v34 = vmul.f32 0.0078125, %v713_v33 }
 0x35e   :  { %v722_v35 = vadd.f32 1e-05, %v718_v34 }
 0x35f   :  { %v715_v36 = vpop.xlane.xlu1 %714 }
 0x360   :  { %828 = vrsqrt.f32 %v722_v35  ;;  %v719_v37 = vmul.f32 0.0078125, %v715_v36 }
 0x362   :  { %v723_v39 = vadd.f32 1e-05, %v719_v37 }
 0x364   :  { %830 = vrsqrt.f32 %v723_v39 }
 0x365   :  { %v825_v41 = vpop.eup %824 }
 0x366   :  { %v728_v43 = vmul.f32 %v825_v41, %v700_v13 }
 0x368   :  { %v736_v44 = vmul.f32 %v735_v40, %v728_v43 }
 0x369   :  { %v827_v45 = vpop.eup %826 }
 0x36a   :  { %v729_v46 = vmul.f32 %v827_v45, %v701_v17  ;;  %v744_v47 = vadd.f32 %v743_v42, %v736_v44 }
 0x36c   :  { %v737_v48 = vmul.f32 %v735_v40, %v729_v46  ;;  %748 = vst [vmem:[#allocation8] sm:$0xff] %v744_v47 }
 0x36d   :  { %v829_v49 = vpop.eup %828 }
 0x36e   :  { %v730_v50 = vmul.f32 %v829_v49, %v702_v21  ;;  %v745_v51 = vadd.f32 %v743_v42, %v737_v48 }
 0x370   :  { %v738_v52 = vmul.f32 %v735_v40, %v730_v50  ;;  %749 = vst [vmem:[#allocation8 + $0x8] sm:$0xff] %v745_v51 }
 0x371   :  { %v831_v53 = vpop.eup %830 }
 0x372   :  { %v731_v54 = vmul.f32 %v831_v53, %v703_v25  ;;  %v746_v56 = vadd.f32 %v743_v42, %v738_v52 }
 0x374   :  { %v739_v61 = vmul.f32 %v735_v40, %v731_v54  ;;  %750 = vst [vmem:[#allocation8 + $0x10] sm:$0xff] %v746_v56 }
 0x376   :  { %v747_v3 = vadd.f32 %v743_v42, %v739_v61 }
 0x378   :  { %751 = vst [vmem:[#allocation8 + $0x18] sm:$0xff] %v747_v3 }
 0x379   :  { %903 = shalt.err (!%p900_p5)
}
 0x37a   :  { %763 = dma.vmem_to_hbm [thread:$0]  %s758_s14, 512, %s1000_s5, [#allocation4], %s925_s9, %s925_s9, %s926_s10  }
 0x37b   :  { %916 = dma.done.wait [#allocation4], 512  }
 0x37c   :  { %917 = vsyncadd [#allocation4], 4294966784 }
 0x37d   :  { %767 = vsyncpa [#allocation3], 1 }
 0x37e   :  { %768 = vsyncpa [#allocation6], 1 }
 0x37f   :  { %769 = vsyncpa [#allocation4], 1 }

</bundles_post_ra>
